<compile_context>
chip_gen: v7x
topology: tpu7x:2x2x1
jax: 0.10.0
libtpu: 0.0.40
codegen_flags: <defaults>
</compile_context>

<pallas_src>
import functools
import math

import jax
import jax.numpy as jnp
from jax.experimental import pallas as pl
from jax.experimental.pallas import tpu as pltpu


def _layernorm_kernel(x_ref, a_ref, b_ref, o_ref, *, eps, features, padded_features):
    # x_ref: (TR, Fp), a_ref/b_ref: (1, Fp), o_ref: (TR, Fp)
    x = x_ref[...].astype(jnp.float32)

    # Mean over the *real* features (padded lanes are zero, so sum is correct).
    mean = jnp.sum(x, axis=-1, keepdims=True) * jnp.float32(1.0 / features)
    diff = x - mean
    if features != padded_features:
        # Zero out the padded lanes so they don't contribute to the variance.
        lane = jax.lax.broadcasted_iota(jnp.int32, x.shape, dimension=1)
        diff = jnp.where(lane < features, diff, 0.0)

    # Unbiased variance (torch.std default: correction = 1). Division is per-row
    # (TR, 1), not per-element. features == 1 yields nan, matching torch.std.
    var = jnp.sum(diff * diff, axis=-1, keepdims=True) / jnp.float32(features - 1)
    std = jnp.sqrt(var)

    # Exact per-row reciprocal (keeps 1e-5-level agreement with the PyTorch ref),
    # broadcast-multiplied over the tile: VALU mul/add only, no per-element divide.
    inv = jnp.float32(1.0) / (std + jnp.float32(eps))

    a = a_ref[...].astype(jnp.float32)
    b = b_ref[...].astype(jnp.float32)
    y = (diff * inv) * a + b
    o_ref[...] = y.astype(o_ref.dtype)


def layer_norm(x, a_2, b_2, eps=1e-6, tile_rows=None):
    """LayerNorm over the last axis of x.

    x:   (..., features)
    a_2: (features,)   scale
    b_2: (features,)   shift
    """
    orig_shape = x.shape
    features = int(orig_shape[-1])
    rows = int(math.prod(orig_shape[:-1])) if len(orig_shape) > 1 else 1

    itemsize = jnp.dtype(x.dtype).itemsize
    # Sublane alignment for the row (second-minor) dim: 8 for f32, 16 for bf16.
    row_align = max(8, 32 // itemsize)

    # Lane-dense output: pad narrow feature dims up to one full vreg row (128 lanes).
    # Typical BERT widths (768, 1024, ...) need no padding. Wider, non-multiple-of-128
    # feature counts keep the full width (allowed: block dim == full array dim) to avoid
    # inflating HBM traffic on a bandwidth-bound kernel.
    padded_features = 128 if features < 128 else features

    # Row-tile selection: target ~2 MiB per (input or output) block so that
    # double-buffered in+out blocks plus in-kernel f32 temporaries stay well under
    # v5e's 16 MiB / v7x's 32 MiB scoped VMEM defaults, while each grid step still
    # moves megabytes (amortizing the ~0.35 us per-step pipeline overhead).
    if tile_rows is None:
        target_block_bytes = 2 * 1024 * 1024
        tr = target_block_bytes // max(1, padded_features * itemsize)
        tr = min(tr, 2048)
    else:
        tr = int(tile_rows)
    tr = max(row_align, (tr // row_align) * row_align)           # 8/16-aligned
    tr = min(tr, ((rows + row_align - 1) // row_align) * row_align)  # don't exceed data

    # Pad rows up to a multiple of the tile instead of shrinking the tile.
    padded_rows = ((rows + tr - 1) // tr) * tr

    x2 = x.reshape(rows, features)
    if padded_rows != rows or padded_features != features:
        x2 = jnp.pad(x2, ((0, padded_rows - rows), (0, padded_features - features)))
    a2 = a_2.reshape(1, features)
    b2 = b_2.reshape(1, features)
    if padded_features != features:
        a2 = jnp.pad(a2, ((0, 0), (0, padded_features - features)))
        b2 = jnp.pad(b2, ((0, 0), (0, padded_features - features)))

    kernel = functools.partial(
        _layernorm_kernel, eps=eps, features=features, padded_features=padded_features
    )

    out = pl.pallas_call(
        kernel,
        out_shape=jax.ShapeDtypeStruct((padded_rows, padded_features), x.dtype),
        grid_spec=pltpu.PrefetchScalarGridSpec(
            num_scalar_prefetch=0,
            grid=(padded_rows // tr,),
            in_specs=[
                pl.BlockSpec((tr, padded_features), lambda i: (i, 0)),
                pl.BlockSpec((1, padded_features), lambda i: (0, 0)),
                pl.BlockSpec((1, padded_features), lambda i: (0, 0)),
            ],
            out_specs=pl.BlockSpec((tr, padded_features), lambda i: (i, 0)),
        ),
        compiler_params=pltpu.CompilerParams(
            dimension_semantics=("parallel",),
            vmem_limit_bytes=32 * 1024 * 1024,
        ),
    )(x2, a2, b2)

    if padded_rows != rows or padded_features != features:
        out = out[:rows, :features]
    return out.reshape(orig_shape)


if __name__ == "__main__":
    key = jax.random.PRNGKey(0)
    batch, seq, hidden = 2, 8, 32

    x = jax.random.normal(key, (batch, seq, hidden), dtype=jnp.float32)

    # Deterministic parameter init, matching nn.Parameter(torch.ones/zeros(features))
    a_2 = jnp.ones((hidden,), dtype=jnp.float32)
    b_2 = jnp.zeros((hidden,), dtype=jnp.float32)

    out = layer_norm(x, a_2, b_2, eps=1e-6)
    out = jax.block_until_ready(out)

    # Pure-JAX reference (unbiased std, eps added to std) for sanity.
    mean = jnp.mean(x, axis=-1, keepdims=True)
    std = jnp.sqrt(jnp.sum((x - mean) ** 2, axis=-1, keepdims=True) / (hidden - 1))
    ref = a_2 * (x - mean) / (std + 1e-6) + b_2
    assert jnp.allclose(out, ref, atol=1e-5, rtol=1e-5), "mismatch vs reference"

    print("KERNEL_OK")
</pallas_src>

<mosaic_0001>
module attributes {stable_mosaic.version = 11 : i64} {
  func.func @_layernorm_kernel(%arg0: i32, %arg1: memref<16x128xf32, #tpu.memory_space<vmem>>, %arg2: memref<1x128xf32, #tpu.memory_space<vmem>>, %arg3: memref<1x128xf32, #tpu.memory_space<vmem>>, %arg4: memref<16x128xf32, #tpu.memory_space<vmem>>) attributes {dimension_semantics = [#tpu.dimension_semantics<parallel>], iteration_bounds = array<i64: 1>, scalar_prefetch = 0 : i64, scratch_operands = 0 : i64, tpu.core_type = #tpu.core_type<tc>, window_params = [{transform_indices = @transform_0, window_bounds = array<i64: 16, 128>}, {pipeline_mode = #tpu.pipeline_mode<synchronous>, transform_indices = @transform_1, window_bounds = array<i64: 1, 128>}, {pipeline_mode = #tpu.pipeline_mode<synchronous>, transform_indices = @transform_2, window_bounds = array<i64: 1, 128>}, {transform_indices = @transform_3, window_bounds = array<i64: 16, 128>}]} {
    %c0 = arith.constant 0 : index
    %c0_0 = arith.constant 0 : index
    %0 = vector.load %arg1[%c0, %c0_0] : memref<16x128xf32, #tpu.memory_space<vmem>>, vector<16x128xf32>
    %cst = arith.constant dense<0.000000e+00> : vector<16xf32>
    %1 = vector.multi_reduction <add>, %0, %cst [1] : vector<16x128xf32> to vector<16xf32>
    %2 = vector.shape_cast %1 : vector<16xf32> to vector<16x1xf32>
    %cst_1 = arith.constant 3.125000e-02 : f32
    %3 = vector.broadcast %cst_1 : f32 to vector<16x1xf32>
    %4 = arith.mulf %2, %3 : vector<16x1xf32>
    %5 = vector.broadcast %4 : vector<16x1xf32> to vector<16x128xf32>
    %6 = arith.subf %0, %5 : vector<16x128xf32>
    %7 = tpu.iota {dimensions = array<i32: 1>} : vector<16x128xi32>
    %c32_i32 = arith.constant 32 : i32
    %8 = vector.broadcast %c32_i32 : i32 to vector<16x128xi32>
    %9 = arith.cmpi slt, %7, %8 : vector<16x128xi32>
    %cst_2 = arith.constant 0.000000e+00 : f32
    %10 = vector.broadcast %cst_2 : f32 to vector<16x128xf32>
    %11 = arith.select %9, %6, %10 : vector<16x128xi1>, vector<16x128xf32>
    %12 = arith.mulf %11, %11 : vector<16x128xf32>
    %cst_3 = arith.constant dense<0.000000e+00> : vector<16xf32>
    %13 = vector.multi_reduction <add>, %12, %cst_3 [1] : vector<16x128xf32> to vector<16xf32>
    %14 = vector.shape_cast %13 : vector<16xf32> to vector<16x1xf32>
    %cst_4 = arith.constant 3.100000e+01 : f32
    %15 = vector.broadcast %cst_4 : f32 to vector<16x1xf32>
    %16 = arith.divf %14, %15 : vector<16x1xf32>
    %17 = math.sqrt %16 : vector<16x1xf32>
    %cst_5 = arith.constant 9.99999997E-7 : f32
    %18 = vector.broadcast %cst_5 : f32 to vector<16x1xf32>
    %19 = arith.addf %17, %18 : vector<16x1xf32>
    %cst_6 = arith.constant 1.000000e+00 : f32
    %20 = vector.broadcast %cst_6 : f32 to vector<16x1xf32>
    %21 = arith.divf %20, %19 : vector<16x1xf32>
    %c0_7 = arith.constant 0 : index
    %c0_8 = arith.constant 0 : index
    %22 = vector.load %arg2[%c0_7, %c0_8] : memref<1x128xf32, #tpu.memory_space<vmem>>, vector<1x128xf32>
    %c0_9 = arith.constant 0 : index
    %c0_10 = arith.constant 0 : index
    %23 = vector.load %arg3[%c0_9, %c0_10] : memref<1x128xf32, #tpu.memory_space<vmem>>, vector<1x128xf32>
    %24 = vector.broadcast %21 : vector<16x1xf32> to vector<16x128xf32>
    %25 = arith.mulf %11, %24 : vector<16x128xf32>
    %26 = vector.broadcast %22 : vector<1x128xf32> to vector<16x128xf32>
    %27 = arith.mulf %25, %26 : vector<16x128xf32>
    %28 = vector.broadcast %23 : vector<1x128xf32> to vector<16x128xf32>
    %29 = arith.addf %27, %28 : vector<16x128xf32>
    %c0_11 = arith.constant 0 : index
    %c0_12 = arith.constant 0 : index
    %30 = vector.load %arg4[%c0_11, %c0_12] : memref<16x128xf32, #tpu.memory_space<vmem>>, vector<16x128xf32>
    tpu.vector_store %arg4[%c0_11, %c0_12], %29 {strides = array<i32>} : memref<16x128xf32, #tpu.memory_space<vmem>>, vector<16x128xf32>,
    return
  }
  func.func @transform_0(%arg0: i32) -> (i32, i32) {
    %c0_i32 = arith.constant 0 : i32
    %c0_i32_0 = arith.constant 0 : i32
    return %arg0, %c0_i32 : i32, i32
  }
  func.func @transform_1(%arg0: i32) -> (i32, i32) {
    %c0_i32 = arith.constant 0 : i32
    %c0_i32_0 = arith.constant 0 : i32
    %c0_i32_1 = arith.constant 0 : i32
    return %c0_i32, %c0_i32_0 : i32, i32
  }
  func.func @transform_2(%arg0: i32) -> (i32, i32) {
    %c0_i32 = arith.constant 0 : i32
    %c0_i32_0 = arith.constant 0 : i32
    %c0_i32_1 = arith.constant 0 : i32
    return %c0_i32, %c0_i32_0 : i32, i32
  }
  func.func @transform_3(%arg0: i32) -> (i32, i32) {
    %c0_i32 = arith.constant 0 : i32
    %c0_i32_0 = arith.constant 0 : i32
    return %arg0, %c0_i32 : i32, i32
  }
}

</mosaic_0001>

<bundles_post_ra>
// kernel: tpu_custom_call.1
= control target key start
LH: loop header
LB: loop body
LE: loop exit
PB: predicated region body
PF: predicated region fallthrough
CT: control target
= control target key end

     0   :  { %8 = vsyncpa [#allocation3], 0  ;;  %s234_s0 = inlined_call_operand.hbm [shape: f32[16,128], index: 0, kind: input, shape index: {}]   ;;  %s235_s1 = inlined_call_operand.vmem [shape: f32[1,128], index: 1, kind: input, shape index: {}]   ;;  %s236_s2 = inlined_call_operand.vmem [shape: f32[1,128], index: 2, kind: input, shape index: {}]   ;;  %s237_s3 = inlined_call_operand.hbm [shape: f32[16,128], index: 3, kind: output, shape index: {}]  }
   0x1   :  { %9 = vsyncpa [#allocation4], 0  ;;  %s174_s12 = smov [#allocation2]   ;;  %s126_s16 = scalar_lea.hbm %s234_s0, 256 }
   0x2   :  { %s15_s13 = sshll.u32 %s174_s12, 4  ;;  %p127_p0 = scmp.ne.s32.totalorder %s234_s0, %s126_s16  ;;  %s16_s13 = int_to_ptr.vmem [resolvable:$true] %s15_s13 }
   0x3   :  { %p130_p1 = scmp.lt.u32.totalorder %s126_s16, %s234_s0 }
   0x5   :  { %p132_p2 = pnand %p130_p1, %p127_p0 }
   0x7   :  { %135 = shalt.err (!%p132_p2)
}
   0x8   :  { %s136_s21 = scalar_lea.vmem %s16_s13, 256  ;;  %p141_p4 = scmp.lt.s32.totalorder %s16_s13, %s16_s13 }
   0x9   :  { %p137_p3 = scmp.ne.s32.totalorder %s16_s13, %s136_s21  ;;  %p142_p5 = scmp.lt.s32.totalorder %s136_s21, %s136_s21 }
   0xb   :  { %p143_p6 = por %p142_p5, %p141_p4 }
   0xd   :  { %p144_p7 = pnand %p143_p6, %p137_p3 }
   0xf   :  { %147 = shalt.err (!%p144_p7)
}
  0x10   :  { %s175_s22 = smov 128   ;;  %s176_s23 = smov 8  }
  0x11   :  { %21 = dma.hbm_to_vmem [thread:$0]  %s234_s0, 256, %s16_s13, [#allocation3], %s175_s22, %s175_s22, %s176_s23  }
  0x12   :  { %170 = dma.done.wait [#allocation3], 256  }
  0x13   :  { %171 = vsyncadd [#allocation3], 4294967040  ;;  %v29_v0 = vld [vmem:[#allocation2] sm:$0xff]  ;;  %v30_v1 = vld [vmem:[#allocation2 + $0x8] sm:$0xff]  ;;  %v39_v2 = vlaneseq  ;;  %s177_s29 = smov [#allocation5]  }
  0x14   :  { %31 = vadd.xlane.f32.xlu0 %v29_v0  ;;  %v112_v31 = vld [vmem:[%s235_s1] ss:$0 sm:$0xff]  ;;  %s100_s30 = sshll.u32 %s177_s29, 4  ;;  %s101_s30 = int_to_ptr.vmem [resolvable:$true] %s100_s30 }
  0x15   :  { %v40_v3 = vand.u32 127, %v39_v2  ;;  %v113_v33 = vld [vmem:[%s236_s2] ss:$0 sm:$0xff]  ;;  %s148_s4 = scalar_lea.vmem %s101_s30, 256  ;;  %p153_p9 = scmp.lt.s32.totalorder %s101_s30, %s101_s30 }
  0x16   :  { %p149_p8 = scmp.ne.s32.totalorder %s101_s30, %s148_s4  ;;  %p154_p10 = scmp.lt.s32.totalorder %s148_s4, %s148_s4 }
  0x17   :  { %vm41_vm0 = vcmp.lt.s32.totalorder %v40_v3, 32 }
  0x18   :  { %33 = vadd.xlane.f32.xlu0 %v30_v1  ;;  %p155_p11 = por %p154_p10, %p153_p9 }
  0x1a   :  { %p156_p12 = pnand %p155_p11, %p149_p8 }
  0xa1   :  { %v32_v4 = vpop.xlane.xlu0 %31 }
  0xa2   :  { %v35_v5 = vmul.f32 0.03125, %v32_v4 }
  0xa4   :  { %v37_v6 = vsub.f32 %v29_v0, %v35_v5 }
  0xa5   :  { %v34_v7 = vpop.xlane.xlu0 %33 }
  0xa6   :  { %v36_v8 = vmul.f32 0.03125, %v34_v7  ;;  %v42_v9 = vsel %vm41_vm0, %v37_v6, 0.0 }
  0xa7   :  { %v44_v10 = vmul.f32 %v42_v9, %v42_v9 }
  0xa8   :  { %v38_v11 = vsub.f32 %v30_v1, %v36_v8 }
  0xa9   :  { %46 = vadd.xlane.f32.xlu1 %v44_v10 }
  0xaa   :  { %v43_v12 = vsel %vm41_vm0, %v38_v11, 0.0 }
  0xab   :  { %v45_v13 = vmul.f32 %v43_v12, %v43_v12 }
  0xad   :  { %48 = vadd.xlane.f32.xlu1 %v45_v13 }
 0x136   :  { %v47_v14 = vpop.xlane.xlu1 %46 }
 0x137   :  { %v51_v15 = vmul.f32 0.032258064, %v47_v14 }
 0x139   :  { %118 = vrsqrt.f32 %v51_v15  ;;  %vm55_vm1 = vcmp.eq.f32.partialorder %v51_v15, inf  ;;  %v58_v20 = vand.u32 2147483648, %v51_v15  ;;  %vm57_vm2 = vcmp.eq.f32.partialorder %v51_v15, 0.0 }
 0x13a   :  { %v49_v16 = vpop.xlane.xlu1 %48 }
 0x13b   :  { %v52_v17 = vmul.f32 0.032258064, %v49_v16 }
 0x13d   :  { %120 = vrsqrt.f32 %v52_v17  ;;  %vm62_vm3 = vcmp.eq.f32.partialorder %v52_v17, inf  ;;  %v65_v26 = vand.u32 2147483648, %v52_v17  ;;  %vm64_vm4 = vcmp.eq.f32.partialorder %v52_v17, 0.0 }
 0x143   :  { %v119_v18 = vpop.eup %118 }
 0x144   :  { %v54_v19 = vmul.f32 %v119_v18, %v51_v15 }
 0x146   :  { %v56_v21 = vsel %vm55_vm1, %v51_v15, %v54_v19 }
 0x147   :  { %v121_v22 = vpop.eup %120  ;;  %v59_v23 = vsel %vm57_vm2, %v58_v20, %v56_v21 }
 0x148   :  { %v61_v24 = vmul.f32 %v121_v22, %v52_v17  ;;  %v67_v25 = vadd.f32 1e-06, %v59_v23 }
 0x14a   :  { %v63_v27 = vsel %vm62_vm3, %v52_v17, %v61_v24  ;;  %122 = vrcp.f32 %v67_v25 }
 0x14b   :  { %v66_v28 = vsel %vm64_vm4, %v65_v26, %v63_v27 }
 0x14c   :  { %v68_v29 = vadd.f32 1e-06, %v66_v28 }
 0x14e   :  { %124 = vrcp.f32 %v68_v29 }
 0x154   :  { %v123_v30 = vpop.eup %122 }
 0x155   :  { %v75_v32 = vmul.f32 %v123_v30, %v42_v9 }
 0x157   :  { %v83_v34 = vmul.f32 %v112_v31, %v75_v32 }
 0x158   :  { %v125_v35 = vpop.eup %124 }
 0x159   :  { %v76_v36 = vmul.f32 %v125_v35, %v43_v12  ;;  %v91_v37 = vadd.f32 %v113_v33, %v83_v34 }
 0x15b   :  { %v84_v38 = vmul.f32 %v112_v31, %v76_v36  ;;  %93 = vst [vmem:[#allocation5] sm:$0xff] %v91_v37 }
 0x15d   :  { %v92_v39 = vadd.f32 %v113_v33, %v84_v38 }
 0x15f   :  { %94 = vst [vmem:[#allocation5 + $0x8] sm:$0xff] %v92_v39 }
 0x160   :  { %159 = shalt.err (!%p156_p12)
}
 0x161   :  { %s160_s5 = scalar_lea.hbm %s237_s3, 256 }
 0x162   :  { %p161_p13 = scmp.ne.s32.totalorder %s237_s3, %s160_s5  ;;  %p164_p0 = scmp.lt.u32.totalorder %s160_s5, %s237_s3 }
 0x164   :  { %p166_p1 = pnand %p164_p0, %p161_p13 }
 0x166   :  { %169 = shalt.err (!%p166_p1)
}
 0x167   :  { %106 = dma.vmem_to_hbm [thread:$0]  %s101_s30, 256, %s237_s3, [#allocation4], %s175_s22, %s175_s22, %s176_s23  }
 0x168   :  { %172 = dma.done.wait [#allocation4], 256  }
 0x169   :  { %173 = vsyncadd [#allocation4], 4294967040 }
 0x16a   :  { %110 = vsyncpa [#allocation3], 1 }
 0x16b   :  { %111 = vsyncpa [#allocation4], 1 }

</bundles_post_ra>
